<compile_context>
chip_gen: v5e
topology: v5e:2x2
jax: 0.10.0
libtpu: 0.0.40
codegen_flags: <defaults>
</compile_context>

<pallas_src>
import functools

import jax
import jax.numpy as jnp
from jax.experimental import pallas as pl
from jax.experimental.pallas import tpu as pltpu

EPS = 1e-5
_VMEM_CAP = 64 << 20  # stay inside v7x's 64 MiB physical VMEM


# ----------------------------------------------------------------------------
# shared per-layer math (runs on values already loaded from VMEM refs)
# ----------------------------------------------------------------------------
def _layer_compute(h, w, gamma, beta, relu):
    """Linear (bias-free) + BatchNorm1d(train) + optional ReLU, f32 accumulate."""
    # MXU: native-dtype operands (f32 or bf16), f32 accumulation.
    y = jnp.dot(h, w, preferred_element_type=jnp.float32)

    # Per-feature batch statistics, single pass: var = E[y^2] - E[y]^2.
    mean = jnp.mean(y, axis=0, keepdims=True)                       # (1, TN)
    var = jnp.maximum(jnp.mean(y * y, axis=0, keepdims=True) - mean * mean, 0.0)

    # Fold gamma into the normalization scale (one fewer full-tile multiply);
    # rsqrt goes to the EUP slot so the scale prep is essentially free.
    scale = gamma.astype(jnp.float32) * jax.lax.rsqrt(var + EPS)    # (1, TN)
    shift = beta.astype(jnp.float32) - mean * scale                 # (1, TN)
    out = y * scale + shift
    if relu:
        out = jnp.maximum(out, 0.0)
    return out


# ----------------------------------------------------------------------------
# path 1: per-layer kernel, tiled over the output-feature axis
# ----------------------------------------------------------------------------
def _linear_bn_kernel(x_ref, w_ref, g_ref, beta_ref, o_ref, *, relu):
    out = _layer_compute(x_ref[...], w_ref[...], g_ref[...], beta_ref[...], relu)
    o_ref[...] = out.astype(o_ref.dtype)


def _pick_tn(dout):
    """Largest lane-aligned feature tile that divides Dout (whole Dout if small)."""
    for cand in (512, 256, 128):
        if dout % cand == 0 and dout > cand:
            return cand
    return dout


def _tiled_vmem_budget(batch, din, tn, x_item, w_item, o_item):
    x_bytes = batch * din * x_item                 # resident (single buffer)
    w_bytes = 2 * din * tn * w_item                # double-buffered weight tile
    vec_bytes = 2 * 2 * tn * w_item                # gamma + beta, double-buffered
    out_bytes = 2 * batch * tn * o_item            # double-buffered output tile
    need = x_bytes + w_bytes + vec_bytes + out_bytes
    return int(min(max(4 * need, 8 << 20), _VMEM_CAP))


def linear_bn(x, w, gamma, beta, *, relu, tn=None):
    """One fused Linear + BN(+ReLU) layer, grid over Dout feature tiles."""
    B, Din = x.shape
    Dout = w.shape[1]
    if tn is None:
        tn = _pick_tn(Dout)
    grid = (Dout // tn,)

    kernel = functools.partial(_linear_bn_kernel, relu=relu)
    vmem_bytes = _tiled_vmem_budget(
        B, Din, tn, x.dtype.itemsize, w.dtype.itemsize, x.dtype.itemsize)

    return pl.pallas_call(
        kernel,
        out_shape=jax.ShapeDtypeStruct((B, Dout), x.dtype),
        grid=grid,
        in_specs=[
            # x: same block index at every grid point -> stays VMEM-resident.
            pl.BlockSpec((B, Din), lambda j: (0, 0)),
            pl.BlockSpec((Din, tn), lambda j: (0, j)),
            pl.BlockSpec((1, tn), lambda j: (0, j)),
            pl.BlockSpec((1, tn), lambda j: (0, j)),
        ],
        out_specs=pl.BlockSpec((B, tn), lambda j: (0, j)),
        compiler_params=pltpu.CompilerParams(
            dimension_semantics=("parallel",),       # BN is per-feature: independent tiles
            vmem_limit_bytes=vmem_bytes,
        ),
    )(x, w, gamma, beta)


# ----------------------------------------------------------------------------
# path 2: fully fused 3-layer kernel for small / latency-dominated configs
# ----------------------------------------------------------------------------
def _make_fused_kernel(relus):
    n_layers = len(relus)

    def kernel(x_ref, *refs):
        o_ref = refs[-1]
        h = x_ref[...]
        for i in range(n_layers):
            w_ref, g_ref, be_ref = refs[3 * i], refs[3 * i + 1], refs[3 * i + 2]
            h = _layer_compute(h, w_ref[...], g_ref[...], be_ref[...], relus[i])
        o_ref[...] = h.astype(o_ref.dtype)

    return kernel


def fused_projection_mlp(params, x, num_layers=3):
    (w1, _, g1, be1), (w2, _, g2, be2), (w3, _, g3, be3) = params
    if num_layers == 3:
        layers = [(w1, g1, be1, True), (w2, g2, be2, True), (w3, g3, be3, False)]
    elif num_layers == 2:
        layers = [(w1, g1, be1, True), (w3, g3, be3, False)]
    else:
        raise Exception

    operands = []
    relus = []
    for (w, g, be, relu) in layers:
        operands += [w, g, be]
        relus.append(relu)

    B = x.shape[0]
    Dout = layers[-1][0].shape[1]
    out_shape = jax.ShapeDtypeStruct((B, Dout), x.dtype)

    need = x.size * x.dtype.itemsize + out_shape.size * x.dtype.itemsize
    need += sum(p.size * p.dtype.itemsize for p in operands)
    vmem_bytes = int(min(max(4 * need, 8 << 20), _VMEM_CAP))

    return pl.pallas_call(
        _make_fused_kernel(tuple(relus)),
        out_shape=out_shape,
        compiler_params=pltpu.CompilerParams(vmem_limit_bytes=vmem_bytes),
    )(x, *operands)


# ----------------------------------------------------------------------------
# module-level forward + parameter init
# ----------------------------------------------------------------------------
def _should_fuse(params, x):
    """Fuse all 3 layers when everything comfortably fits in VMEM."""
    total = x.size * x.dtype.itemsize
    for layer in params:
        for p in layer:
            total += p.size * p.dtype.itemsize
    return total <= (8 << 20)


def projection_mlp_forward(params, x, num_layers=3, fuse=None):
    if fuse is None:
        fuse = _should_fuse(params, x)
    if fuse:
        return fused_projection_mlp(params, x, num_layers)

    # Tiled per-layer path.  The Linear bias (params[i][1]) is intentionally
    # not passed: training-mode BN subtracts the batch mean, which cancels a
    # per-feature constant bias exactly.
    (w1, _, g1, be1), (w2, _, g2, be2), (w3, _, g3, be3) = params
    if num_layers == 3:
        x = linear_bn(x, w1, g1, be1, relu=True)
        x = linear_bn(x, w2, g2, be2, relu=True)
        x = linear_bn(x, w3, g3, be3, relu=False)
    elif num_layers == 2:
        x = linear_bn(x, w1, g1, be1, relu=True)
        x = linear_bn(x, w3, g3, be3, relu=False)
    else:
        raise Exception
    return x


def init_projection_mlp_params(key, in_dim, hidden_dim=32, out_dim=32,
                               dtype=jnp.float32):
    """Synthetic parameters mirroring projection_MLP.__init__.

    Linear weight/bias: uniform(-1/sqrt(fan_in), 1/sqrt(fan_in)) like PyTorch.
    BatchNorm: gamma=1, beta=0 (PyTorch defaults).  Layer3's BN in the
    reference module is BatchNorm1d(hidden_dim); keep hidden_dim == out_dim
    as in the default 2048/2048 configuration.
    """
    dims = [(in_dim, hidden_dim), (hidden_dim, hidden_dim), (hidden_dim, out_dim)]
    params = []
    for (d_in, d_out) in dims:
        k_w, k_b, key = jax.random.split(key, 3)
        bound = float(1.0 / (d_in ** 0.5))
        w = jax.random.uniform(k_w, (d_in, d_out), dtype, -bound, bound)
        b = jax.random.uniform(k_b, (1, d_out), dtype, -bound, bound)
        gamma = jnp.ones((1, d_out), dtype)
        beta = jnp.zeros((1, d_out), dtype)
        params.append((w, b, gamma, beta))
    return params


# ----------------------------------------------------------------------------
# plain-JAX reference (includes the Linear bias, to verify the cancellation)
# ----------------------------------------------------------------------------
def _reference_forward(params, x, num_layers=3):
    def layer(h, w, b, g, be, relu):
        y = h.astype(jnp.float32) @ w.astype(jnp.float32) + b.astype(jnp.float32)
        mean = jnp.mean(y, axis=0, keepdims=True)
        var = jnp.mean((y - mean) ** 2, axis=0, keepdims=True)
        out = (y - mean) / jnp.sqrt(var + EPS) * g + be
        return jnp.maximum(out, 0.0) if relu else out

    (w1, b1, g1, be1), (w2, b2, g2, be2), (w3, b3, g3, be3) = params
    if num_layers == 3:
        x = layer(x, w1, b1, g1, be1, True)
        x = layer(x, w2, b2, g2, be2, True)
        x = layer(x, w3, b3, g3, be3, False)
    elif num_layers == 2:
        x = layer(x, w1, b1, g1, be1, True)
        x = layer(x, w3, b3, g3, be3, False)
    else:
        raise Exception
    return x


if __name__ == "__main__":
    key = jax.random.PRNGKey(0)
    k_x, k_p = jax.random.split(key)

    batch, in_dim, hidden_dim, out_dim = 8, 16, 32, 32
    x = jax.random.normal(k_x, (batch, in_dim), jnp.float32)
    params = init_projection_mlp_params(k_p, in_dim, hidden_dim, out_dim)

    ref = _reference_forward(params, x, num_layers=3)

    # Exercise both execution paths.
    out_tiled = jax.block_until_ready(
        projection_mlp_forward(params, x, num_layers=3, fuse=False))
    out_fused = jax.block_until_ready(
        projection_mlp_forward(params, x, num_layers=3, fuse=True))

    assert out_tiled.shape == (batch, out_dim)
    assert out_fused.shape == (batch, out_dim)
    assert jnp.allclose(out_tiled, ref, atol=1e-4, rtol=1e-4)
    assert jnp.allclose(out_fused, ref, atol=1e-4, rtol=1e-4)

    print("KERNEL_OK")
</pallas_src>

<mosaic_0001>
module attributes {stable_mosaic.version = 11 : i64} {
  func.func @_linear_bn_kernel(%arg0: i32, %arg1: memref<8x16xf32, #tpu.memory_space<vmem>>, %arg2: memref<16x32xf32, #tpu.memory_space<vmem>>, %arg3: memref<1x32xf32, #tpu.memory_space<vmem>>, %arg4: memref<1x32xf32, #tpu.memory_space<vmem>>, %arg5: memref<8x32xf32, #tpu.memory_space<vmem>>) attributes {dimension_semantics = [#tpu.dimension_semantics<parallel>], iteration_bounds = array<i64: 1>, scalar_prefetch = 0 : i64, scratch_operands = 0 : i64, tpu.core_type = #tpu.core_type<tc>, window_params = [{pipeline_mode = #tpu.pipeline_mode<synchronous>, transform_indices = @transform_0, window_bounds = array<i64: 8, 16>}, {transform_indices = @transform_1, window_bounds = array<i64: 16, 32>}, {transform_indices = @transform_2, window_bounds = array<i64: 1, 32>}, {transform_indices = @transform_3, window_bounds = array<i64: 1, 32>}, {transform_indices = @transform_4, window_bounds = array<i64: 8, 32>}]} {
    %c0 = arith.constant 0 : index
    %c0_0 = arith.constant 0 : index
    %0 = vector.load %arg1[%c0, %c0_0] : memref<8x16xf32, #tpu.memory_space<vmem>>, vector<8x16xf32>
    %c0_1 = arith.constant 0 : index
    %c0_2 = arith.constant 0 : index
    %1 = vector.load %arg2[%c0_1, %c0_2] : memref<16x32xf32, #tpu.memory_space<vmem>>, vector<16x32xf32>
    %c0_3 = arith.constant 0 : index
    %c0_4 = arith.constant 0 : index
    %2 = vector.load %arg3[%c0_3, %c0_4] : memref<1x32xf32, #tpu.memory_space<vmem>>, vector<1x32xf32>
    %c0_5 = arith.constant 0 : index
    %c0_6 = arith.constant 0 : index
    %3 = vector.load %arg4[%c0_5, %c0_6] : memref<1x32xf32, #tpu.memory_space<vmem>>, vector<1x32xf32>
    %cst = arith.constant dense<0.000000e+00> : vector<8x32xf32>
    %4 = tpu.matmul %0, %1, %cst {dimension_numbers = #tpu.dot_dimension_numbers<[1], [0], [0], [1], [0, 0, 1, 1], [], []>} : vector<8x16xf32>, vector<16x32xf32>, vector<8x32xf32> -> vector<8x32xf32>
    %cst_7 = arith.constant dense<0.000000e+00> : vector<32xf32>
    %5 = vector.multi_reduction <add>, %4, %cst_7 [0] : vector<8x32xf32> to vector<32xf32>
    %6 = vector.shape_cast %5 : vector<32xf32> to vector<1x32xf32>
    %cst_8 = arith.constant 8.000000e+00 : f32
    %7 = vector.broadcast %cst_8 : f32 to vector<1x32xf32>
    %8 = arith.divf %6, %7 : vector<1x32xf32>
    %9 = arith.mulf %4, %4 : vector<8x32xf32>
    %cst_9 = arith.constant dense<0.000000e+00> : vector<32xf32>
    %10 = vector.multi_reduction <add>, %9, %cst_9 [0] : vector<8x32xf32> to vector<32xf32>
    %11 = vector.shape_cast %10 : vector<32xf32> to vector<1x32xf32>
    %cst_10 = arith.constant 8.000000e+00 : f32
    %12 = vector.broadcast %cst_10 : f32 to vector<1x32xf32>
    %13 = arith.divf %11, %12 : vector<1x32xf32>
    %14 = arith.mulf %8, %8 : vector<1x32xf32>
    %15 = arith.subf %13, %14 : vector<1x32xf32>
    %cst_11 = arith.constant 0.000000e+00 : f32
    %16 = vector.broadcast %cst_11 : f32 to vector<1x32xf32>
    %17 = arith.maximumf %15, %16 : vector<1x32xf32>
    %cst_12 = arith.constant 9.99999974E-6 : f32
    %18 = vector.broadcast %cst_12 : f32 to vector<1x32xf32>
    %19 = arith.addf %17, %18 : vector<1x32xf32>
    %20 = math.rsqrt %19 : vector<1x32xf32>
    %21 = arith.mulf %2, %20 : vector<1x32xf32>
    %22 = arith.mulf %8, %21 : vector<1x32xf32>
    %23 = arith.subf %3, %22 : vector<1x32xf32>
    %24 = vector.broadcast %21 : vector<1x32xf32> to vector<8x32xf32>
    %25 = arith.mulf %4, %24 : vector<8x32xf32>
    %26 = vector.broadcast %23 : vector<1x32xf32> to vector<8x32xf32>
    %27 = arith.addf %25, %26 : vector<8x32xf32>
    %cst_13 = arith.constant 0.000000e+00 : f32
    %28 = vector.broadcast %cst_13 : f32 to vector<8x32xf32>
    %29 = arith.maximumf %27, %28 : vector<8x32xf32>
    %c0_14 = arith.constant 0 : index
    %c0_15 = arith.constant 0 : index
    %30 = vector.load %arg5[%c0_14, %c0_15] : memref<8x32xf32, #tpu.memory_space<vmem>>, vector<8x32xf32>
    tpu.vector_store %arg5[%c0_14, %c0_15], %29 {strides = array<i32>} : memref<8x32xf32, #tpu.memory_space<vmem>>, vector<8x32xf32>,
    return
  }
  func.func @transform_0(%arg0: i32) -> (i32, i32) {
    %c0_i32 = arith.constant 0 : i32
    %c0_i32_0 = arith.constant 0 : i32
    %c0_i32_1 = arith.constant 0 : i32
    return %c0_i32, %c0_i32_0 : i32, i32
  }
  func.func @transform_1(%arg0: i32) -> (i32, i32) {
    %c0_i32 = arith.constant 0 : i32
    %c0_i32_0 = arith.constant 0 : i32
    return %c0_i32, %arg0 : i32, i32
  }
  func.func @transform_2(%arg0: i32) -> (i32, i32) {
    %c0_i32 = arith.constant 0 : i32
    %c0_i32_0 = arith.constant 0 : i32
    return %c0_i32, %arg0 : i32, i32
  }
  func.func @transform_3(%arg0: i32) -> (i32, i32) {
    %c0_i32 = arith.constant 0 : i32
    %c0_i32_0 = arith.constant 0 : i32
    return %c0_i32, %arg0 : i32, i32
  }
  func.func @transform_4(%arg0: i32) -> (i32, i32) {
    %c0_i32 = arith.constant 0 : i32
    %c0_i32_0 = arith.constant 0 : i32
    return %c0_i32, %arg0 : i32, i32
  }
}

</mosaic_0001>

<bundles_post_ra>
// kernel: tpu_custom_call.1
= control target key start
LH: loop header
LB: loop body
LE: loop exit
PB: predicated region body
PF: predicated region fallthrough
CT: control target
= control target key end

     0   :  { %9 = vsyncpa [#allocation3], 0  ;;  %s285_s0 = inlined_call_operand.hbm [shape: f32[8,16], index: 0, kind: input, shape index: {}]   ;;  %s286_s1 = inlined_call_operand.hbm [shape: f32[16,32], index: 1, kind: input, shape index: {}]   ;;  %s287_s2 = inlined_call_operand.vmem [shape: f32[1,32], index: 2, kind: input, shape index: {}]   ;;  %s288_s3 = inlined_call_operand.vmem [shape: f32[1,32], index: 3, kind: input, shape index: {}]   ;;  %s289_s4 = inlined_call_operand.hbm [shape: f32[8,32], index: 4, kind: output, shape index: {}]  }
   0x1   :  { %10 = vsyncpa [#allocation6], 0 }
   0x2   :  { %11 = vsyncpa [#allocation4], 0  ;;  %s17_s17 = sshll.u32 %s285_s0, 4  ;;  %s236_s18 = smov [#allocation2]   ;;  %s18_s17 = int_to_ptr.hbm [resolvable:$true] %s17_s17 }
   0x3   :  { %s19_s19 = sshll.u32 %s236_s18, 4  ;;  %s27_s22 = sshll.u32 %s286_s1, 4  ;;  %s20_s19 = int_to_ptr.vmem [resolvable:$true] %s19_s19  ;;  %s28_s22 = int_to_ptr.hbm [resolvable:$true] %s27_s22 }
   0x4   :  { %22 = dma.hbm_to_vmem [thread:$0]  %s18_s17, 128, %s20_s19, [#allocation3]  }
   0x5   :  { %s237_s23 = smov [#allocation5]   ;;  %s238_s25 = smov 128  }
   0x6   :  { %s29_s24 = sshll.u32 %s237_s23, 4  ;;  %s239_s26 = smov 8   ;;  %s30_s24 = int_to_ptr.vmem [resolvable:$true] %s29_s24 }
   0x7   :  { %35 = dma.hbm_to_vmem [thread:$0]  %s28_s22, 256, %s30_s24, [#allocation6], %s238_s25, %s238_s25, %s239_s26  }
   0x8   :  { %230 = dma.done.wait [#allocation3], 128  }
   0x9   :  { %231 = vsyncadd [#allocation3], 4294967168 }
   0xa   :  { %232 = dma.done.wait [#allocation6], 256  }
   0xb   :  { %233 = vsyncadd [#allocation6], 4294967040  ;;  %v50_v0 = vld [vmem:[#allocation5 + $0x8] sm:$0xff]  ;;  %v49_v1 = vld [vmem:[#allocation5] sm:$0xff]  ;;  %vm53_vm0 = vcmask 130048   ;;  %v240_v3 = vmov 8.0  }
   0xc   :  { %71 = vmatpush.msra.mxu0 %v50_v0  ;;  %v48_v2 = vld [vmem:[#allocation2] sm:$0xff]  ;;  %154 = vrcp.f32 %v240_v3  ;;  %vm77_vm1 = vcmask 261120   ;;  %s241_s29 = smov [#allocation7]  }
   0xd   :  { %v51_v37 = vld [vmem:[%s287_s2] sm:$0x1]  ;;  %s134_s30 = sshll.u32 %s241_s29, 4  ;;  %s136_s2 = sshll.u32 %s289_s4, 4  ;;  %s135_s30 = int_to_ptr.vmem [resolvable:$true] %s134_s30  ;;  %s137_s2 = int_to_ptr.hbm [resolvable:$true] %s136_s2 }
   0xe   :  { %72 = vmatpush.msra.mxu0 %v49_v1  ;;  %v52_v41 = vld [vmem:[%s288_s3] sm:$0x1] }
   0xf   :  { %147 = vmatmul.msk.f32.vlgmr.msra.gmra.mxu0 %vm53_vm0, %v48_v2 }
  0x12   :  { %v155_v4 = vpop.eup %154 }
  0x13   :  { %v86_v5 = vmul.f32 8.0, %v155_v4  ;;  %vm90_vm2 = vweird.f32 %v155_v4 }
  0x15   :  { %v87_v6 = vsub.f32 1.0, %v86_v5 }
  0x17   :  { %v88_v11 = vmul.f32 %v155_v4, %v87_v6 }
  0x19   :  { %v89_v17 = vadd.f32 %v155_v4, %v88_v11 }
  0x1b   :  { %v91_v22 = vsel %vm90_vm2, %v155_v4, %v89_v17 }
  0x8c   :  { %v74_v7 = vpop.f32.mrf.mxu0 }
  0x8d   :  { %v78_v8 = vsel %vm77_vm1, %v74_v7, 0.0  ;;  %v93_v9 = vmul.f32 %v74_v7, %v74_v7 }
  0x8e   :  { %v79_v10 = vrot.slane %v78_v8, 4 }
  0x8f   :  { %v94_v12 = vsel %vm77_vm1, %v93_v9, 0.0 }
  0x90   :  { %v80_v13 = vadd.f32 %v79_v10, %v78_v8  ;;  %v95_v14 = vrot.slane %v94_v12, 4 }
  0x92   :  { %v81_v15 = vrot.slane %v80_v13, 2  ;;  %v96_v16 = vadd.f32 %v95_v14, %v94_v12 }
  0x94   :  { %v82_v18 = vadd.f32 %v81_v15, %v80_v13  ;;  %v97_v19 = vrot.slane %v96_v16, 2 }
  0x96   :  { %v83_v20 = vrot.slane %v82_v18, 1  ;;  %v98_v21 = vadd.f32 %v97_v19, %v96_v16 }
  0x98   :  { %v84_v23 = vadd.f32 %v83_v20, %v82_v18  ;;  %v99_v24 = vrot.slane %v98_v21, 1 }
  0x9a   :  { %v92_v25 = vmul.f32 %v91_v22, %v84_v23  ;;  %v100_v26 = vadd.f32 %v99_v24, %v98_v21 }
  0x9c   :  { %v101_v27 = vmul.f32 %v100_v26, %v91_v22  ;;  %v102_v28 = vmul.f32 %v92_v25, %v92_v25 }
  0x9e   :  { %v103_v29 = vsub.f32 %v101_v27, %v102_v28 }
  0xa0   :  { %v104_v30 = vmax.f32 %v103_v29, 0.0 }
  0xa2   :  { %v105_v31 = vadd.f32 1e-05, %v104_v30 }
  0xa4   :  { %156 = vrsqrt.f32 %v105_v31  ;;  %vm112_vm4 = vweird.f32 %v105_v31 }
  0xaa   :  { %v157_v32 = vpop.eup %156 }
  0xab   :  { %v107_v33 = vmul.f32 %v157_v32, %v105_v31  ;;  %vm113_vm3 = vweird.f32 %v157_v32 }
  0xac   :  { %vm114_vm5 = vmor %vm112_vm4, %vm113_vm3 }
  0xad   :  { %v108_v34 = vmul.f32 %v157_v32, %v107_v33 }
  0xaf   :  { %v109_v35 = vmul.f32 0.5, %v108_v34 }
  0xb1   :  { %v110_v36 = vsub.f32 1.5, %v109_v35 }
  0xb3   :  { %v111_v38 = vmul.f32 %v157_v32, %v110_v36 }
  0xb5   :  { %v115_v39 = vsel %vm114_vm5, %v157_v32, %v111_v38 }
  0xb6   :  { %v116_v40 = vmul.f32 %v115_v39, %v51_v37 }
  0xb8   :  { %v117_v42 = vmul.f32 %v116_v40, %v92_v25  ;;  %v120_v43 = vperm.slane %v116_v40, 0 }
  0xba   :  { %v118_v44 = vsub.f32 %v52_v41, %v117_v42  ;;  %v122_v45 = vmul.f32 %v120_v43, %v74_v7 }
  0xbc   :  { %v124_v46 = vperm.slane %v118_v44, 0 }
  0xbe   :  { %v126_v47 = vadd.f32 %v124_v46, %v122_v45 }
  0xc0   :  { %v127_v48 = vmax.f32 %v126_v47, 0.0 }
  0xc2   :  { %128 = vst.msk [vmem:[#allocation7] sm:$0xff] %vm77_vm1, %v127_v48 }
  0xc3   :  { %139 = dma.vmem_to_hbm [thread:$0]  %s135_s30, 128, %s137_s2, [#allocation4]  }
  0xc4   :  { %234 = dma.done.wait [#allocation4], 128  }
  0xc5   :  { %235 = vsyncadd [#allocation4], 4294967168 }
  0xc6   :  { %144 = vsyncpa [#allocation3], 1 }
  0xc7   :  { %145 = vsyncpa [#allocation6], 1 }
  0xc8   :  { %146 = vsyncpa [#allocation4], 1 }

</bundles_post_ra>
